<compile_context>
chip_gen: v5e
topology: v5e:2x2
jax: 0.10.0
libtpu: 0.0.40
codegen_flags: <defaults>
</compile_context>

<pallas_src>
import functools

import jax
import jax.numpy as jnp
from jax.experimental import pallas as pl
from jax.experimental.pallas import tpu as pltpu


def _round_up(x, m):
    return (x + m - 1) // m * m


def vae_fwd_kernel(x_ref, w1_ref, b1_ref, w2m_ref, b2m_ref, w2s_ref, b2s_ref,
                   w3_ref, b3_ref, w4_ref, b4_ref, eps_ref, m_ref, out_ref):
    # encoder: fc1 + relu  (bf16 MXU inputs, f32 accumulation; cast done in VMEM)
    x = x_ref[...].astype(jnp.bfloat16)
    h1 = jnp.dot(x, w1_ref[...], preferred_element_type=jnp.float32) + b1_ref[...]
    h1 = jnp.maximum(h1, 0.0)
    h1b = h1.astype(jnp.bfloat16)

    # latent heads (true width, no lane padding)
    m = jnp.dot(h1b, w2m_ref[...], preferred_element_type=jnp.float32) + b2m_ref[...]
    log_s = jnp.dot(h1b, w2s_ref[...], preferred_element_type=jnp.float32) + b2s_ref[...]

    # reparameterize: z = eps * exp(0.5 * log_s) + m   (eps ~ U[0,1), host-generated)
    z = eps_ref[...] * jnp.exp(0.5 * log_s) + m

    # decoder: fc3 + relu, fc4 + sigmoid
    h3 = jnp.dot(z.astype(jnp.bfloat16), w3_ref[...],
                 preferred_element_type=jnp.float32) + b3_ref[...]
    h3 = jnp.maximum(h3, 0.0)
    logits = jnp.dot(h3.astype(jnp.bfloat16), w4_ref[...],
                     preferred_element_type=jnp.float32) + b4_ref[...]
    # sigmoid: exp -> EUP, approx reciprocal -> EUP (VPU slot stays free)
    out = pl.reciprocal(1.0 + jnp.exp(-logits), approx=True)

    # true-width stores (narrow masked vst, but minimal HBM writeback bytes)
    m_ref[...] = m
    out_ref[...] = out


def prepack_params(params):
    """One-time packing: bf16 matmul weights, f32 biases (hoisted out of forward)."""
    (w1, b1, w2m, b2m, w2s, b2s, w3, b3, w4, b4) = params
    bf16 = jnp.bfloat16
    f32 = jnp.float32
    return (w1.astype(bf16), b1.astype(f32),
            w2m.astype(bf16), b2m.astype(f32),
            w2s.astype(bf16), b2s.astype(f32),
            w3.astype(bf16), b3.astype(f32),
            w4.astype(bf16), b4.astype(f32))


def _choose_tiles(batch):
    """Batch tile (multiple of 8) and an even number of grid steps (>=2) so v7x
    megacore has work; big tiles (<=2048 rows) amortize per-step overhead."""
    b8 = _round_up(max(batch, 8), 8)
    if b8 <= 8:
        return 8, 1
    tb_cap = 2048
    n_steps = max(2, pl.cdiv(b8, tb_cap))
    if n_steps % 2:
        n_steps += 1
    tb = _round_up(pl.cdiv(b8, n_steps), 8)
    return tb, n_steps


def vae_forward(inp, packed_params, eps, *, input_dim):
    """inp: any shape with total elements divisible by input_dim (like .view(-1, input_dim))."""
    x = inp.reshape(-1, input_dim).astype(jnp.float32)
    B = x.shape[0]

    (w1, b1, w2m, b2m, w2s, b2s, w3, b3, w4, b4) = packed_params
    hidden_dim = w1.shape[1]
    latent_dim = w2m.shape[1]
    output_dim = w4.shape[1]

    TB, n_steps = _choose_tiles(B)
    b_pad = TB * n_steps

    if b_pad != B:
        x = jnp.pad(x, ((0, b_pad - B), (0, 0)))
    eps_p = eps.astype(jnp.float32)
    if b_pad != B:
        eps_p = jnp.pad(eps_p, ((0, b_pad - B), (0, 0)))

    operands = (x, w1, b1, w2m, b2m, w2s, b2s, w3, b3, w4, b4, eps_p)

    def resident(a):  # constant block index -> stays in VMEM across the grid
        return pl.BlockSpec(a.shape, lambda i: (0, 0))

    in_specs = [
        pl.BlockSpec((TB, input_dim), lambda i: (i, 0)),      # x (f32, true width)
        resident(w1), resident(b1),
        resident(w2m), resident(b2m),
        resident(w2s), resident(b2s),
        resident(w3), resident(b3),
        resident(w4), resident(b4),
        pl.BlockSpec((TB, latent_dim), lambda i: (i, 0)),     # eps (true width)
    ]
    out_specs = (
        pl.BlockSpec((TB, latent_dim), lambda i: (i, 0)),     # m  (true width)
        pl.BlockSpec((TB, output_dim), lambda i: (i, 0)),     # out (true width)
    )
    out_shape = (
        jax.ShapeDtypeStruct((b_pad, latent_dim), jnp.float32),
        jax.ShapeDtypeStruct((b_pad, output_dim), jnp.float32),
    )

    # cost estimate
    flops = 2 * b_pad * (input_dim * hidden_dim + 2 * hidden_dim * latent_dim
                         + latent_dim * hidden_dim + hidden_dim * output_dim)
    transcendentals = b_pad * (latent_dim + 2 * output_dim)  # exp, exp+recip
    bytes_accessed = int(sum(int(a.size) * a.dtype.itemsize for a in operands)
                         + b_pad * (latent_dim + output_dim) * 4)

    # VMEM limit derived from actual need (double-buffered streams + resident weights)
    row_bytes = 4 * (input_dim + 2 * latent_dim + output_dim)      # x, eps, m, out (f32)
    weight_bytes = sum(int(a.size) * a.dtype.itemsize
                       for a in (w1, b1, w2m, b2m, w2s, b2s, w3, b3, w4, b4))
    vmem_need = 2 * TB * row_bytes + 2 * weight_bytes + (1 << 20)  # + internal scratch margin
    vmem_limit = int(min(32 * 1024 * 1024, max(4 * 1024 * 1024, 2 * vmem_need)))

    m_p, out_p = pl.pallas_call(
        vae_fwd_kernel,
        out_shape=out_shape,
        grid=(n_steps,),
        in_specs=in_specs,
        out_specs=out_specs,
        compiler_params=pltpu.CompilerParams(
            dimension_semantics=("parallel",),
            vmem_limit_bytes=vmem_limit,
        ),
        cost_estimate=pl.CostEstimate(
            flops=int(flops),
            transcendentals=int(transcendentals),
            bytes_accessed=bytes_accessed,
        ),
    )(*operands)

    # strip batch padding (no lane padding to strip anymore)
    return m_p[:B], out_p[:B]


def init_params(key, input_dim, latent_dim, hidden_dim, output_dim):
    """Deterministic synthetic params. Weights stored [in, out], biases [1, out]."""
    def linear(key, fan_in, fan_out):
        kw, kb = jax.random.split(key)
        bound = 1.0 / jnp.sqrt(fan_in)
        w = jax.random.uniform(kw, (fan_in, fan_out), jnp.float32, -bound, bound)
        b = jax.random.uniform(kb, (1, fan_out), jnp.float32, -bound, bound)
        return w, b

    k1, k2m, k2s, k3, k4 = jax.random.split(key, 5)
    w1, b1 = linear(k1, input_dim, hidden_dim)
    w2m, b2m = linear(k2m, hidden_dim, latent_dim)
    w2s, b2s = linear(k2s, hidden_dim, latent_dim)
    w3, b3 = linear(k3, latent_dim, hidden_dim)
    w4, b4 = linear(k4, hidden_dim, output_dim)
    return (w1, b1, w2m, b2m, w2s, b2s, w3, b3, w4, b4)


if __name__ == "__main__":
    input_dim, latent_dim, hidden_dim, output_dim = 16, 8, 32, 16

    key = jax.random.PRNGKey(0)
    k_in, k_eps, k_par = jax.random.split(key, 3)

    # input like a small tensor; forward flattens it to (-1, input_dim).
    # 2*5*16 / 16 = 10 rows -> exercises batch padding (10 -> 16) and a 2-step grid.
    inp = jax.random.normal(k_in, (2, 5, 16), jnp.float32)
    B = inp.size // input_dim

    params = init_params(k_par, input_dim, latent_dim, hidden_dim, output_dim)
    packed = prepack_params(params)   # one-time weight packing, outside the fwd path

    # eps ~ Uniform[0,1), matching torch.rand_like in reparameterize
    # TODO(synk): eps is host-generated (not in-kernel pltpu PRNG) so it can bit-match the reference.
    eps = jax.random.uniform(k_eps, (B, latent_dim), jnp.float32)

    m, x_out = vae_forward(inp, packed, eps, input_dim=input_dim)
    jax.block_until_ready((m, x_out))

    # pure-JAX f32 reference (kernel uses bf16 MXU inputs -> compare loosely)
    xf = inp.reshape(-1, input_dim)
    (w1, b1, w2m, b2m, w2s, b2s, w3, b3, w4, b4) = params
    h1 = jnp.maximum(xf @ w1 + b1, 0.0)
    log_s = h1 @ w2s + b2s
    m_ref = h1 @ w2m + b2m
    z = eps * jnp.exp(0.5 * log_s) + m_ref
    h3 = jnp.maximum(z @ w3 + b3, 0.0)
    x_ref = jax.nn.sigmoid(h3 @ w4 + b4)

    assert m.shape == (B, latent_dim) and x_out.shape == (B, output_dim)
    assert jnp.allclose(m, m_ref, atol=3e-2, rtol=3e-2), "mu mismatch"
    assert jnp.allclose(x_out, x_ref, atol=3e-2, rtol=3e-2), "recon mismatch"
    assert bool(jnp.all(jnp.isfinite(m))) and bool(jnp.all(jnp.isfinite(x_out)))

    print("KERNEL_OK")
</pallas_src>

<mosaic_0001>
module attributes {stable_mosaic.version = 11 : i64} {
  func.func @vae_fwd_kernel(%arg0: i32, %arg1: memref<8x16xf32, #tpu.memory_space<vmem>>, %arg2: memref<16x32xbf16, #tpu.memory_space<vmem>>, %arg3: memref<1x32xf32, #tpu.memory_space<vmem>>, %arg4: memref<32x8xbf16, #tpu.memory_space<vmem>>, %arg5: memref<1x8xf32, #tpu.memory_space<vmem>>, %arg6: memref<32x8xbf16, #tpu.memory_space<vmem>>, %arg7: memref<1x8xf32, #tpu.memory_space<vmem>>, %arg8: memref<8x32xbf16, #tpu.memory_space<vmem>>, %arg9: memref<1x32xf32, #tpu.memory_space<vmem>>, %arg10: memref<32x16xbf16, #tpu.memory_space<vmem>>, %arg11: memref<1x16xf32, #tpu.memory_space<vmem>>, %arg12: memref<8x8xf32, #tpu.memory_space<vmem>>, %arg13: memref<8x8xf32, #tpu.memory_space<vmem>>, %arg14: memref<8x16xf32, #tpu.memory_space<vmem>>) attributes {dimension_semantics = [#tpu.dimension_semantics<parallel>], iteration_bounds = array<i64: 2>, scalar_prefetch = 0 : i64, scratch_operands = 0 : i64, tpu.core_type = #tpu.core_type<tc>, window_params = [{transform_indices = @transform_0, window_bounds = array<i64: 8, 16>}, {pipeline_mode = #tpu.pipeline_mode<synchronous>, transform_indices = @transform_1, window_bounds = array<i64: 16, 32>}, {pipeline_mode = #tpu.pipeline_mode<synchronous>, transform_indices = @transform_2, window_bounds = array<i64: 1, 32>}, {pipeline_mode = #tpu.pipeline_mode<synchronous>, transform_indices = @transform_3, window_bounds = array<i64: 32, 8>}, {pipeline_mode = #tpu.pipeline_mode<synchronous>, transform_indices = @transform_4, window_bounds = array<i64: 1, 8>}, {pipeline_mode = #tpu.pipeline_mode<synchronous>, transform_indices = @transform_5, window_bounds = array<i64: 32, 8>}, {pipeline_mode = #tpu.pipeline_mode<synchronous>, transform_indices = @transform_6, window_bounds = array<i64: 1, 8>}, {pipeline_mode = #tpu.pipeline_mode<synchronous>, transform_indices = @transform_7, window_bounds = array<i64: 8, 32>}, {pipeline_mode = #tpu.pipeline_mode<synchronous>, transform_indices = @transform_8, window_bounds = array<i64: 1, 32>}, {pipeline_mode = #tpu.pipeline_mode<synchronous>, transform_indices = @transform_9, window_bounds = array<i64: 32, 16>}, {pipeline_mode = #tpu.pipeline_mode<synchronous>, transform_indices = @transform_10, window_bounds = array<i64: 1, 16>}, {transform_indices = @transform_11, window_bounds = array<i64: 8, 8>}, {transform_indices = @transform_12, window_bounds = array<i64: 8, 8>}, {transform_indices = @transform_13, window_bounds = array<i64: 8, 16>}]} {
    %c0 = arith.constant 0 : index
    %c0_0 = arith.constant 0 : index
    %0 = vector.load %arg1[%c0, %c0_0] : memref<8x16xf32, #tpu.memory_space<vmem>>, vector<8x16xf32>
    %1 = arith.truncf %0 : vector<8x16xf32> to vector<8x16xbf16>
    %c0_1 = arith.constant 0 : index
    %c0_2 = arith.constant 0 : index
    %2 = vector.load %arg2[%c0_1, %c0_2] : memref<16x32xbf16, #tpu.memory_space<vmem>>, vector<16x32xbf16>
    %cst = arith.constant dense<0.000000e+00> : vector<8x32xf32>
    %3 = tpu.matmul %1, %2, %cst {dimension_numbers = #tpu.dot_dimension_numbers<[1], [0], [0], [1], [0, 0, 1, 1], [], []>} : vector<8x16xbf16>, vector<16x32xbf16>, vector<8x32xf32> -> vector<8x32xf32>
    %c0_3 = arith.constant 0 : index
    %c0_4 = arith.constant 0 : index
    %4 = vector.load %arg3[%c0_3, %c0_4] : memref<1x32xf32, #tpu.memory_space<vmem>>, vector<1x32xf32>
    %5 = vector.broadcast %4 : vector<1x32xf32> to vector<8x32xf32>
    %6 = arith.addf %3, %5 : vector<8x32xf32>
    %cst_5 = arith.constant 0.000000e+00 : f32
    %7 = vector.broadcast %cst_5 : f32 to vector<8x32xf32>
    %8 = arith.maximumf %6, %7 : vector<8x32xf32>
    %9 = arith.truncf %8 : vector<8x32xf32> to vector<8x32xbf16>
    %c0_6 = arith.constant 0 : index
    %c0_7 = arith.constant 0 : index
    %10 = vector.load %arg4[%c0_6, %c0_7] : memref<32x8xbf16, #tpu.memory_space<vmem>>, vector<32x8xbf16>
    %cst_8 = arith.constant dense<0.000000e+00> : vector<8x8xf32>
    %11 = tpu.matmul %9, %10, %cst_8 {dimension_numbers = #tpu.dot_dimension_numbers<[1], [0], [0], [1], [0, 0, 1, 1], [], []>} : vector<8x32xbf16>, vector<32x8xbf16>, vector<8x8xf32> -> vector<8x8xf32>
    %c0_9 = arith.constant 0 : index
    %c0_10 = arith.constant 0 : index
    %12 = vector.load %arg5[%c0_9, %c0_10] : memref<1x8xf32, #tpu.memory_space<vmem>>, vector<1x8xf32>
    %13 = vector.broadcast %12 : vector<1x8xf32> to vector<8x8xf32>
    %14 = arith.addf %11, %13 : vector<8x8xf32>
    %c0_11 = arith.constant 0 : index
    %c0_12 = arith.constant 0 : index
    %15 = vector.load %arg6[%c0_11, %c0_12] : memref<32x8xbf16, #tpu.memory_space<vmem>>, vector<32x8xbf16>
    %cst_13 = arith.constant dense<0.000000e+00> : vector<8x8xf32>
    %16 = tpu.matmul %9, %15, %cst_13 {dimension_numbers = #tpu.dot_dimension_numbers<[1], [0], [0], [1], [0, 0, 1, 1], [], []>} : vector<8x32xbf16>, vector<32x8xbf16>, vector<8x8xf32> -> vector<8x8xf32>
    %c0_14 = arith.constant 0 : index
    %c0_15 = arith.constant 0 : index
    %17 = vector.load %arg7[%c0_14, %c0_15] : memref<1x8xf32, #tpu.memory_space<vmem>>, vector<1x8xf32>
    %18 = vector.broadcast %17 : vector<1x8xf32> to vector<8x8xf32>
    %19 = arith.addf %16, %18 : vector<8x8xf32>
    %c0_16 = arith.constant 0 : index
    %c0_17 = arith.constant 0 : index
    %20 = vector.load %arg12[%c0_16, %c0_17] : memref<8x8xf32, #tpu.memory_space<vmem>>, vector<8x8xf32>
    %cst_18 = arith.constant 5.000000e-01 : f32
    %21 = vector.broadcast %cst_18 : f32 to vector<8x8xf32>
    %22 = arith.mulf %21, %19 : vector<8x8xf32>
    %23 = math.exp %22 : vector<8x8xf32>
    %24 = arith.mulf %20, %23 : vector<8x8xf32>
    %25 = arith.addf %24, %14 : vector<8x8xf32>
    %26 = arith.truncf %25 : vector<8x8xf32> to vector<8x8xbf16>
    %c0_19 = arith.constant 0 : index
    %c0_20 = arith.constant 0 : index
    %27 = vector.load %arg8[%c0_19, %c0_20] : memref<8x32xbf16, #tpu.memory_space<vmem>>, vector<8x32xbf16>
    %cst_21 = arith.constant dense<0.000000e+00> : vector<8x32xf32>
    %28 = tpu.matmul %26, %27, %cst_21 {dimension_numbers = #tpu.dot_dimension_numbers<[1], [0], [0], [1], [0, 0, 1, 1], [], []>} : vector<8x8xbf16>, vector<8x32xbf16>, vector<8x32xf32> -> vector<8x32xf32>
    %c0_22 = arith.constant 0 : index
    %c0_23 = arith.constant 0 : index
    %29 = vector.load %arg9[%c0_22, %c0_23] : memref<1x32xf32, #tpu.memory_space<vmem>>, vector<1x32xf32>
    %30 = vector.broadcast %29 : vector<1x32xf32> to vector<8x32xf32>
    %31 = arith.addf %28, %30 : vector<8x32xf32>
    %cst_24 = arith.constant 0.000000e+00 : f32
    %32 = vector.broadcast %cst_24 : f32 to vector<8x32xf32>
    %33 = arith.maximumf %31, %32 : vector<8x32xf32>
    %34 = arith.truncf %33 : vector<8x32xf32> to vector<8x32xbf16>
    %c0_25 = arith.constant 0 : index
    %c0_26 = arith.constant 0 : index
    %35 = vector.load %arg10[%c0_25, %c0_26] : memref<32x16xbf16, #tpu.memory_space<vmem>>, vector<32x16xbf16>
    %cst_27 = arith.constant dense<0.000000e+00> : vector<8x16xf32>
    %36 = tpu.matmul %34, %35, %cst_27 {dimension_numbers = #tpu.dot_dimension_numbers<[1], [0], [0], [1], [0, 0, 1, 1], [], []>} : vector<8x32xbf16>, vector<32x16xbf16>, vector<8x16xf32> -> vector<8x16xf32>
    %c0_28 = arith.constant 0 : index
    %c0_29 = arith.constant 0 : index
    %37 = vector.load %arg11[%c0_28, %c0_29] : memref<1x16xf32, #tpu.memory_space<vmem>>, vector<1x16xf32>
    %38 = vector.broadcast %37 : vector<1x16xf32> to vector<8x16xf32>
    %39 = arith.addf %36, %38 : vector<8x16xf32>
    %cst_30 = arith.constant 0.000000e+00 : f32
    %40 = vector.broadcast %cst_30 : f32 to vector<8x16xf32>
    %41 = arith.subf %40, %39 : vector<8x16xf32>
    %42 = math.exp %41 : vector<8x16xf32>
    %cst_31 = arith.constant 1.000000e+00 : f32
    %43 = vector.broadcast %cst_31 : f32 to vector<8x16xf32>
    %44 = arith.addf %43, %42 : vector<8x16xf32>
    %45 = tpu.reciprocal %44 {approx = true} : vector<8x16xf32> -> vector<8x16xf32>
    %c0_32 = arith.constant 0 : index
    %c0_33 = arith.constant 0 : index
    %46 = vector.load %arg13[%c0_32, %c0_33] : memref<8x8xf32, #tpu.memory_space<vmem>>, vector<8x8xf32>
    tpu.vector_store %arg13[%c0_32, %c0_33], %14 {strides = array<i32>} : memref<8x8xf32, #tpu.memory_space<vmem>>, vector<8x8xf32>,
    %c0_34 = arith.constant 0 : index
    %c0_35 = arith.constant 0 : index
    %47 = vector.load %arg14[%c0_34, %c0_35] : memref<8x16xf32, #tpu.memory_space<vmem>>, vector<8x16xf32>
    tpu.vector_store %arg14[%c0_34, %c0_35], %45 {strides = array<i32>} : memref<8x16xf32, #tpu.memory_space<vmem>>, vector<8x16xf32>,
    return
  }
  func.func @transform_0(%arg0: i32) -> (i32, i32) {
    %c0_i32 = arith.constant 0 : i32
    %c0_i32_0 = arith.constant 0 : i32
    return %arg0, %c0_i32 : i32, i32
  }
  func.func @transform_1(%arg0: i32) -> (i32, i32) {
    %c0_i32 = arith.constant 0 : i32
    %c0_i32_0 = arith.constant 0 : i32
    %c0_i32_1 = arith.constant 0 : i32
    return %c0_i32, %c0_i32_0 : i32, i32
  }
  func.func @transform_2(%arg0: i32) -> (i32, i32) {
    %c0_i32 = arith.constant 0 : i32
    %c0_i32_0 = arith.constant 0 : i32
    %c0_i32_1 = arith.constant 0 : i32
    return %c0_i32, %c0_i32_0 : i32, i32
  }
  func.func @transform_3(%arg0: i32) -> (i32, i32) {
    %c0_i32 = arith.constant 0 : i32
    %c0_i32_0 = arith.constant 0 : i32
    %c0_i32_1 = arith.constant 0 : i32
    return %c0_i32, %c0_i32_0 : i32, i32
  }
  func.func @transform_4(%arg0: i32) -> (i32, i32) {
    %c0_i32 = arith.constant 0 : i32
    %c0_i32_0 = arith.constant 0 : i32
    %c0_i32_1 = arith.constant 0 : i32
    return %c0_i32, %c0_i32_0 : i32, i32
  }
  func.func @transform_5(%arg0: i32) -> (i32, i32) {
    %c0_i32 = arith.constant 0 : i32
    %c0_i32_0 = arith.constant 0 : i32
    %c0_i32_1 = arith.constant 0 : i32
    return %c0_i32, %c0_i32_0 : i32, i32
  }
  func.func @transform_6(%arg0: i32) -> (i32, i32) {
    %c0_i32 = arith.constant 0 : i32
    %c0_i32_0 = arith.constant 0 : i32
    %c0_i32_1 = arith.constant 0 : i32
    return %c0_i32, %c0_i32_0 : i32, i32
  }
  func.func @transform_7(%arg0: i32) -> (i32, i32) {
    %c0_i32 = arith.constant 0 : i32
    %c0_i32_0 = arith.constant 0 : i32
    %c0_i32_1 = arith.constant 0 : i32
    return %c0_i32, %c0_i32_0 : i32, i32
  }
  func.func @transform_8(%arg0: i32) -> (i32, i32) {
    %c0_i32 = arith.constant 0 : i32
    %c0_i32_0 = arith.constant 0 : i32
    %c0_i32_1 = arith.constant 0 : i32
    return %c0_i32, %c0_i32_0 : i32, i32
  }
  func.func @transform_9(%arg0: i32) -> (i32, i32) {
    %c0_i32 = arith.constant 0 : i32
    %c0_i32_0 = arith.constant 0 : i32
    %c0_i32_1 = arith.constant 0 : i32
    return %c0_i32, %c0_i32_0 : i32, i32
  }
  func.func @transform_10(%arg0: i32) -> (i32, i32) {
    %c0_i32 = arith.constant 0 : i32
    %c0_i32_0 = arith.constant 0 : i32
    %c0_i32_1 = arith.constant 0 : i32
    return %c0_i32, %c0_i32_0 : i32, i32
  }
  func.func @transform_11(%arg0: i32) -> (i32, i32) {
    %c0_i32 = arith.constant 0 : i32
    %c0_i32_0 = arith.constant 0 : i32
    return %arg0, %c0_i32 : i32, i32
  }
  func.func @transform_12(%arg0: i32) -> (i32, i32) {
    %c0_i32 = arith.constant 0 : i32
    %c0_i32_0 = arith.constant 0 : i32
    return %arg0, %c0_i32 : i32, i32
  }
  func.func @transform_13(%arg0: i32) -> (i32, i32) {
    %c0_i32 = arith.constant 0 : i32
    %c0_i32_0 = arith.constant 0 : i32
    return %arg0, %c0_i32 : i32, i32
  }
}

</mosaic_0001>

<bundles_post_ra>
// kernel: tpu_custom_call.1
= control target key start
LH: loop header
LB: loop body
LE: loop exit
PB: predicated region body
PF: predicated region fallthrough
CT: control target
= control target key end

     0   :  { %s1142_s0 = inlined_call_operand.vmem [shape: f32[16,16], index: 0, kind: input, shape index: {}]   ;;  %s1143_s1 = inlined_call_operand.vmem [shape: bf16[16,32], index: 1, kind: input, shape index: {}]   ;;  %s1144_s2 = inlined_call_operand.vmem [shape: f32[1,32], index: 2, kind: input, shape index: {}]   ;;  %s1145_s3 = inlined_call_operand.vmem [shape: bf16[32,8], index: 3, kind: input, shape index: {}]   ;;  %s1146_s4 = inlined_call_operand.vmem [shape: f32[1,8], index: 4, kind: input, shape index: {}]   ;;  %s1147_s5 = inlined_call_operand.vmem [shape: bf16[32,8], index: 5, kind: input, shape index: {}]   ;;  %s1148_s6 = inlined_call_operand.vmem [shape: f32[1,8], index: 6, kind: input, shape index: {}]   ;;  %s1149_s7 = inlined_call_operand.vmem [shape: bf16[8,32], index: 7, kind: input, shape index: {}]   ;;  %s1150_s8 = inlined_call_operand.vmem [shape: f32[1,32], index: 8, kind: input, shape index: {}]   ;;  %s1151_s9 = inlined_call_operand.vmem [shape: bf16[32,16], index: 9, kind: input, shape index: {}]   ;;  %s1152_s10 = inlined_call_operand.vmem [shape: f32[1,16], index: 10, kind: input, shape index: {}]   ;;  %s1153_s11 = inlined_call_operand.vmem [shape: f32[16,8], index: 11, kind: input, shape index: {}]   ;;  %s1154_s12 = inlined_call_operand.vmem [shape: f32[16,8], index: 12, kind: output, shape index: {0}]   ;;  %s1155_s13 = inlined_call_operand.hbm [shape: f32[16,16], index: 13, kind: output, shape index: {1}]  }
   0x1   :  { %1156 = sst [smem:[#allocation6_spill]] %s1142_s0 }
   0x2   :  { %1157 = sst [smem:[#allocation7_spill]] %s1143_s1 }
   0x3   :  { %1158 = sst [smem:[#allocation8_spill]] %s1144_s2 }
   0x4   :  { %19 = vsyncpa [#allocation3], 0 }
   0x5   :  { %21 = vsyncpa [#allocation3 + $0x1], 0  ;;  %s1000_s25 = smov 0   ;;  %s1002_s26 = smov 0  }
   0x6   :  { %s1004_s27 = smov 0   ;;  %s1006_s28 = smov 0  }
   0x7 LB: > { %s1021_s29 = sadd.s32 4294967295, %s928_s28   ;;  %s764_s30 = sadd.s32 4294967294, %s928_s28   ;;  %s928_s28 = sphi %s1006_s28, %s1169_s28   ;;  %s924_s27 = sphi %s1004_s27, %s1168_s27   ;;  %s920_s26 = sphi %s1002_s26, %s1167_s26   ;;  %s916_s25 = sphi %s1000_s25, %s1166_s25  }
   0x8   : > { %s1025_s14 = sadd.s32 1, %s928_s28   ;;  %s322_s15 = sadd.s32 1, %s924_s27 }
   0x9   : > { %s319_s16 = ssub.s32 %s928_s28, %s1025_s14  ;;  %p332_p0 = scmp.ne.s32.totalorder %s924_s27, %s920_s26 }
   0xa   : > { %p320_p1 = scmp.eq.s32.totalorder %s319_s16, 0  ;;  %p333_p2 = scmp.eq.s32.totalorder %s1021_s29, 1 }
   0xb   : > { %p338_p3 = scmp.ne.s32.totalorder %s920_s26, %s916_s25  ;;  %p339_p4 = scmp.eq.s32.totalorder %s764_s30, 1 }
   0xc   : > { %s1036_s17 = scalar_select %p320_p1, %s924_s27, %s322_s15  }
   0xd   : > { %p1038_p5 = por %p333_p2, %p332_p0  ;;  %p1042_p6 = por %p339_p4, %p338_p3 }
   0xe   : > { %1159 = sst [smem:[#allocation5_spill]] %s1036_s17  ;;  %p767_p7 = scmp.ge.s32.totalorder %s928_s28, 1 }
   0xf   : > { %p401_p8 = scmp.lt.s32.totalorder %s928_s28, 3 }
  0x11   : > { %p402_p9 = pnand %p767_p7, %p401_p8 }
  0x12   : > { %s1162_s1 = sld [smem:[#allocation7_spill]] (!%p402_p9)  ;;  %p452_p10 = scmp.lt.s32.totalorder (!%p402_p9), %s1021_s29, 1 }
  0x13   : > { %405 = sbr.rel (%p402_p9) target bundleno = 603 (0x25b), region = 68  ;;  %s1163_s0 = sld [smem:[#allocation6_spill]] (!%p402_p9) }
  0x14   : > { %s1164_s2 = sld [smem:[#allocation8_spill]] (!%p402_p9)  ;;  %s806_s17 = sshll.u32 (!%p402_p9), %s1021_s29, 3 }
  0x15   : > { %s664_s20 = scalar_lea.hbm (!%p402_p9), %s1155_s13, %s806_s17  ;;  %s886_s17 = scalar_lea.hbm (!%p402_p9), %s1155_s13, 16 }
  0x16   : > { %s668_s24 = sshll.u32 (!%p402_p9), %s664_s20, 4  ;;  %s669_s24 = int_to_ptr.hbm [resolvable:$true] %s668_s24 }
  0x17   : > { %s880_s30 = sshra.s32 (!%p402_p9), %s669_s24, 4  ;;  %s881_s30 = int_to_ptr.hbm [resolvable:$true] %s880_s30 }
  0x18   : > { %v809_v0 = vld [vmem:[%s1162_s1] sm:$0xff]  ;;  %s453_s22 = scalar_select %p452_p10, %s1021_s29, 1  ;;  %vm479_vm0 = vcmask 130048   ;;  %v811_v3 = vld [vmem:[%s1145_s3 + $0x8] sm:$0xff]  ;;  %vm518_vm1 = vcmask 261120   ;;  %vm584_vm2 = vcmask 1043456  }
  0x19   : > { %490 = vmatpush.bf16.msra.mxu0 %v809_v0  ;;  %v813_v4 = vld [vmem:[%s1147_s5 + $0x8] sm:$0xff]  ;;  %528 = vmatpush.bf16.msra.mxu1 %v811_v3  ;;  %v810_v5 = vld [vmem:[%s1145_s3] sm:$0xff]  ;;  %vm580_vm3 = vcmask 64512   ;;  %s882_s29 = scalar_lea.hbm %s881_s30, 8  ;;  %p887_p0 = scmp.lt.s32.totalorder %s881_s30, %s1155_s13 }
  0x1a   : > { %s1053_s23 = sshll.u32 %s453_s22, 3  ;;  %561 = vmatpush.bf16.msra.mxu2 %v813_v4  ;;  %v812_v6 = vld [vmem:[%s1147_s5] sm:$0xff]  ;;  %v815_v15 = vld [vmem:[%s1151_s9 + $0x8] sm:$0xff]  ;;  %p883_p11 = scmp.ne.s32.totalorder %s881_s30, %s882_s29 }
  0x1b   : > { %s455_s15 = scalar_lea.vmem %s1163_s0, %s1053_s23  ;;  %v855_v7 = vld [vmem:[%s1164_s2] ss:$0 sm:$0xff]  ;;  %s463_s1 = scalar_lea.vmem %s1154_s12, %s1053_s23 }
  0x1c   : > { %v465_v1 = vld [vmem:[%s455_s15] sm:$0xff]  ;;  %s459_s21 = scalar_lea.vmem %s1153_s11, %s1053_s23  ;;  %s449_s15 = sand.u32 1, %s920_s26  }
  0x1d   : > { %v466_v2 = vpack.c.bf16 %v465_v1, %v465_v1  ;;  %529 = vmatpush.bf16.msra.mxu1 %v810_v5  ;;  %v575_v13 = vld [vmem:[%s1149_s7] sm:$0xf]  ;;  %632 = vmatpush.bf16.msrb.mxu0 %v815_v15  ;;  %s651_s23 = scalar_lea.sflag [#allocation3], %s449_s15  ;;  %p884_p12 = pnand %p883_p11, %p1038_p5 }
  0x1e   : > { %562 = vmatpush.bf16.msra.mxu2 %v812_v6  ;;  %v586_v14 = vsel %vm584_vm2, %v575_v13, 0  ;;  %v814_v16 = vld [vmem:[%s1151_s9] sm:$0xff]  ;;  %p888_p1 = scmp.lt.s32.totalorder %s886_s17, %s882_s29 }
  0x1f   : > { %776 = vmatmul.msk.bf16.vlgmr.msra.gmra.mxu0 %vm479_vm0, %v466_v2  ;;  %595 = vmatpush.bf16.msra.mxu3 %v586_v14  ;;  %v856_v17 = vld [vmem:[%s1146_s4] ss:$0 sm:$0xff]  ;;  %p885_p13 = pneg %p884_p12 }
  0x20   : > { %v857_v20 = vld [vmem:[%s1148_s6] ss:$0 sm:$0xff]  ;;  %p889_p2 = por %p888_p1, %p887_p0 }
  0x21   : > { %633 = vmatpush.bf16.msrb.mxu0 %v814_v16  ;;  %v568_v27 = vld [vmem:[%s459_s21] sm:$0xff] }
  0x22   : > { %v858_v32 = vld [vmem:[%s1150_s8] ss:$0 sm:$0xff]  ;;  %p890_p3 = pnand %p889_p2, %p885_p13 }
  0x23   : > { %v859_v38 = vld [vmem:[%s1152_s10] ss:$0 sm:$0xff] }
  0x9c   : > { %v492_v8 = vpop.f32.mrf.mxu0 }
  0x9d   : > { %v493_v9 = vadd.f32 %v855_v7, %v492_v8 }
  0x9f   : > { %v496_v10 = vmax.f32 %v493_v9, 0.0 }
  0xa1   : > { %v497_v11 = vpack.c.bf16 %v496_v10, %v496_v10 }
  0xa3   : > { %785 = vmatmul.msk.bf16.vlgmr.msra.gmra.mxu1 %vm518_vm1, %v497_v11  ;;  %794 = vmatmul.msk.bf16.vlgmr.msra.gmra.mxu2 %vm518_vm1, %v497_v11 }
  0xa4   : > { %v494_v12 = vpop.f32.mrf.mxu0 }
 0x120   : > { %v531_v18 = vpop.f32.mrf.mxu1 }
 0x121   : > { %v532_v19 = vadd.f32 %v856_v17, %v531_v18 }
 0x123   : > { %644 = vst.msk [vmem:[%s463_s1] sm:$0xff] %vm580_vm3, %v532_v19  ;;  %s768_s1 = sshll.u32 %s449_s15, 3 }
 0x124   : > { %s451_s21 = scalar_lea.vmem [#allocation2], %s768_s1 }
 0x125   : > { %s666_s22 = sshll.u32 %s451_s21, 4  ;;  %s667_s22 = int_to_ptr.vmem [resolvable:$true] %s666_s22 }
 0x126   : > { %v564_v21 = vpop.f32.mrf.mxu2 }
 0x127   : > { %v565_v22 = vadd.f32 %v857_v20, %v564_v21 }
 0x128   : > { %v533_v23 = vpop.f32.mrf.mxu1 }
 0x129   : > { %v569_v24 = vmul.f32 0.5, %v565_v22 }
 0x12b   : > { %v570_v25 = vmul.f32 1.442695, %v569_v24 }
 0x12d   : > { %860 = vpow2.f32 %v570_v25 }
 0x12e   : > { %v566_v26 = vpop.f32.mrf.mxu2 }
 0x133   : > { %v861_v28 = vpop.eup %860 }
 0x134   : > { %v572_v29 = vmul.f32 %v861_v28, %v568_v27 }
 0x136   : > { %v573_v30 = vadd.f32 %v572_v29, %v532_v19 }
 0x138   : > { %v574_v31 = vpack.c.bf16 %v573_v30, %v573_v30 }
 0x13a   : > { %795 = vmatmul.msk.bf16.vlgmr.msra.gmra.mxu3 %vm580_vm3, %v574_v31 }
 0x1bd   : > { %v597_v33 = vpop.f32.mrf.mxu3 }
 0x1be   : > { %v598_v34 = vadd.f32 %v858_v32, %v597_v33 }
 0x1c0   : > { %v601_v35 = vmax.f32 %v598_v34, 0.0 }
 0x1c2   : > { %v602_v36 = vpack.c.bf16 %v601_v35, %v601_v35 }
 0x1c4   : > { %804 = vmatmul.msk.bf16.vlgmr.msrb.gmra.mxu0 %vm518_vm1, %v602_v36 }
 0x1c5   : > { %v599_v37 = vpop.f32.mrf.mxu3 }
 0x241   : > { %v635_v39 = vpop.f32.mrf.mxu0 }
 0x242   : > { %v636_v40 = vadd.f32 %v859_v38, %v635_v39 }
 0x244   : > { %v639_v41 = vsub.f32 0.0, %v636_v40 }
 0x246   : > { %v640_v42 = vmul.f32 1.442695, %v639_v41 }
 0x248   : > { %862 = vpow2.f32 %v640_v42 }
 0x249   : > { %v637_v43 = vpop.f32.mrf.mxu0 }
 0x24e   : > { %v863_v44 = vpop.eup %862 }
 0x24f   : > { %v642_v45 = vadd.f32 1.0, %v863_v44 }
 0x251   : > { %864 = vrcp.f32 %v642_v45 }
 0x257   : > { %v865_v46 = vpop.eup %864 }
 0x258   : > { %645 = vst.msk [vmem:[%s451_s21] sm:$0xff] %vm479_vm0, %v865_v46 }
 0x259   : > { %893 = shalt.err (!%p890_p3)
}
 0x25a   : > { %816 = dma.vmem_to_hbm [thread:$0]  (%p1038_p5), %s667_s22, 128, %s669_s24, %s651_s23  }
 0x25b PF: > { %p822_p4 = scmp.ge.s32.totalorder %s928_s28, 2  ;;  %s687_s15 = sand.u32 1, %s916_s25  }
 0x25c   : > { %s688_s2 = scalar_lea.sflag [#allocation3], %s687_s15 }
 0x25d   : > { %p819_p7 = pnand %p822_p4, %p1042_p6 }
 0x25f   : > { %p820_p8 = pneg %p819_p7 }
 0x261   : > { %911 = dma.done.wait (%p820_p8), %s688_s2, 128  }
 0x262   : > { %913 = vsyncadd (%p820_p8), %s688_s2, 4294967168  ;;  %s1165_s20 = sld [smem:[#allocation5_spill]]  ;;  %p24_p9 = scmp.ge.s32.totalorder %s1025_s14, 4  }
 0x263   : > { %s1166_s25 = smov %s920_s26  ;;  %s1167_s26 = smov %s924_s27 }
 0x264   : > { %s1169_s28 = smov %s1025_s14  ;;  %26 = sbr.rel (!%p24_p9) target bundleno = 7 (0x7), region = 118 }
 0x268   : > { %s1168_s27 = smov %s1165_s20 }
 0x269   :  { %694 = vsyncpa [#allocation3], 1 }
 0x26a   :  { %696 = vsyncpa [#allocation3 + $0x1], 1 }

</bundles_post_ra>
